<compile_context>
chip_gen: v6e
topology: v6e:2x2x1
jax: 0.10.0
libtpu: 0.0.40
codegen_flags: <defaults>
</compile_context>

<pallas_src>
import functools
from typing import NamedTuple

import jax
import jax.numpy as jnp
from jax import lax
from jax.experimental import pallas as pl
from jax.experimental.pallas import tpu as pltpu


def _cdiv(a: int, b: int) -> int:
    return (a + b - 1) // b


def _round_up(x: int, m: int) -> int:
    return _cdiv(x, m) * m


# ----------------------------- tile selection -----------------------------

_TM_CAP = 512     # batch (sublane) tile cap
_TN_CAP = 1024    # output-feature (lane) tile cap
_TK_CAP = 2048    # contraction tile cap (full K kept resident when K <= cap)


def _choose_tm(batch: int):
    """(tm, B_pad): sublane-aligned batch tile, minimal padding."""
    b8 = _round_up(batch, 8)
    if b8 <= _TM_CAP:
        return b8, b8
    nblocks = _cdiv(b8, _TM_CAP)
    tm = _round_up(_cdiv(b8, nblocks), 8)
    return tm, tm * nblocks


def _choose_tn(n_out: int):
    """(tn, N_pad): lane-aligned output tile.

    Prefers >= 2 blocks along N (so the N grid axis can shard across the two
    TensorCores of a v7x chip even when the batch axis has a single block),
    while first minimizing padded columns and then maximizing tile width.
    """
    n128 = _round_up(n_out, 128)
    if n128 <= 128:
        return n128, n128
    best = None
    tn = 128
    while tn <= min(_TN_CAP, n128):
        nblocks = _cdiv(n128, tn)
        if nblocks >= 2:
            n_pad = nblocks * tn
            key = (n_pad, -tn)              # minimal padding, then widest tile
            if best is None or key < best[0]:
                best = (key, tn, n_pad)
        tn += 128
    if best is None:                        # can only fit a single block
        return n128, n128
    return best[1], best[2]


def _choose_tk(k_in: int):
    """(tk, K_pad): contraction tile.  Full K (zero padding) whenever it fits."""
    if k_in <= _TK_CAP:
        return k_in, k_in
    nblocks = _cdiv(k_in, _TK_CAP)
    tk = _round_up(_cdiv(k_in, nblocks), 128)
    return tk, tk * nblocks


# ------------------------------- parameters -------------------------------

class DenseMeta(NamedTuple):
    n_out: int
    k_in: int
    tn: int
    tk: int


def prepare_dense(weight, bias):
    """One-time (init) prep: transpose to (K, N) and pad to tile multiples.

    weight: (out_features, in_features)   -- PyTorch nn.Linear layout
    bias:   (out_features,)
    """
    n_out, k_in = weight.shape
    tn, n_pad = _choose_tn(n_out)
    tk, k_pad = _choose_tk(k_in)
    w_t = jnp.asarray(weight, jnp.float32).T                      # (K, N), once
    w_t = jnp.pad(w_t, ((0, k_pad - k_in), (0, n_pad - n_out)))
    b2d = jnp.pad(jnp.asarray(bias, jnp.float32), (0, n_pad - n_out))
    b2d = b2d.reshape(1, n_pad)
    # TODO(synk): optionally cast w_t to bf16 here (f32 accumulation keeps the
    # sigmoid output accurate) to halve weight HBM traffic on all generations.
    return w_t, b2d, DenseMeta(n_out, k_in, tn, tk)


# --------------------------------- kernel ---------------------------------

def _dense_kernel(x_ref, w_ref, b_ref, o_ref):
    # x_ref: (tm, tk)  w_ref: (tk, tn)  b_ref: (1, tn)  o_ref: (tm, tn) f32
    k = pl.program_id(2)

    @pl.when(k == 0)
    def _():
        # Output block is resident across the K axis (index_map ignores k):
        # seed it with the bias -> no separate accumulator, no final add.
        o_ref[...] = jnp.broadcast_to(b_ref[...], o_ref.shape)

    o_ref[...] += jnp.dot(
        x_ref[...], w_ref[...],
        preferred_element_type=jnp.float32,
        precision=lax.Precision.HIGHEST,
    )

    @pl.when(k == pl.num_programs(2) - 1)
    def _():
        z = o_ref[...]
        o_ref[...] = 1.0 / (1.0 + jnp.exp(-z))      # sigmoid (exp on the EUP)


# -------------------------------- forward ---------------------------------

@functools.partial(jax.jit, static_argnums=(3,))
def dense_forward(x, w_t, b2d, meta: DenseMeta):
    """sigmoid(x @ weight.T + bias); weight pre-transposed/padded at init."""
    batch, k_in = x.shape
    assert k_in == meta.k_in, "in_features mismatch"
    k_pad, n_pad = w_t.shape
    tn, tk = meta.tn, meta.tk
    tm, b_pad = _choose_tm(batch)

    # Per-call padding touches only x (cheap at small batch); the weight was
    # padded once at init.  Zero-padded K contributes nothing to the matmul.
    if (b_pad, k_pad) != (batch, k_in):
        x = jnp.pad(x, ((0, b_pad - batch), (0, k_pad - k_in)))

    mg, ng, kg = b_pad // tm, n_pad // tn, k_pad // tk

    cost = pl.CostEstimate(
        flops=2 * b_pad * k_pad * n_pad,
        transcendentals=b_pad * n_pad,
        # x re-read once per N block, weight once per M block.
        bytes_accessed=4 * (b_pad * k_pad * ng + k_pad * n_pad * mg
                            + b_pad * n_pad + n_pad),
    )

    # Double-buffered f32 footprint + headroom.  <= ~40 MiB for the largest
    # allowed tiles (safe on v7x 64 MiB VMEM), and raised above the v5e 16 MiB
    # default scoped limit whenever the tiles need it.
    vmem_est = 4 * 2 * (tm * tk + tk * tn + tm * tn + tn)
    vmem_limit = min(100 << 20, max(16 << 20, vmem_est + (8 << 20)))

    out = pl.pallas_call(
        _dense_kernel,
        out_shape=jax.ShapeDtypeStruct((b_pad, n_pad), jnp.float32),
        grid_spec=pltpu.PrefetchScalarGridSpec(
            num_scalar_prefetch=0,
            grid=(mg, ng, kg),
            in_specs=[
                pl.BlockSpec((tm, tk), lambda i, j, k: (i, k)),   # x
                pl.BlockSpec((tk, tn), lambda i, j, k: (k, j)),   # weight (K, N)
                pl.BlockSpec((1, tn), lambda i, j, k: (0, j)),    # bias
            ],
            out_specs=pl.BlockSpec((tm, tn), lambda i, j, k: (i, j)),
        ),
        compiler_params=pltpu.CompilerParams(
            dimension_semantics=("parallel", "parallel", "arbitrary"),
            vmem_limit_bytes=vmem_limit,
        ),
        cost_estimate=cost,
    )(x, w_t, b2d)

    # Padded columns are sigmoid(0)=0.5 and padded rows are garbage; both are
    # sliced off here.
    return out[:batch, :meta.n_out].astype(x.dtype)


# --------------------------------- testing --------------------------------

def _reference(x, weight, bias):
    y = jnp.dot(x, weight.T, precision=lax.Precision.HIGHEST) + bias
    return jax.nn.sigmoid(y)


def _make_inputs(key, batch, in_features, out_features):
    k_x, k_w, k_b = jax.random.split(key, 3)
    x = jax.random.normal(k_x, (batch, in_features), dtype=jnp.float32)
    bound = 1.0 / (in_features ** 0.5)
    weight = jax.random.uniform(
        k_w, (out_features, in_features), dtype=jnp.float32,
        minval=-bound, maxval=bound)
    bias = jax.random.uniform(
        k_b, (out_features,), dtype=jnp.float32, minval=-bound, maxval=bound)
    return x, weight, bias


if __name__ == "__main__":
    key = jax.random.PRNGKey(0)
    k1, k2 = jax.random.split(key)

    # Small shape consistent with the module (nn.Linear + sigmoid).
    x, w, b = _make_inputs(k1, batch=8, in_features=32, out_features=64)
    w_t, b2d, meta = prepare_dense(w, b)
    out = jax.block_until_ready(dense_forward(x, w_t, b2d, meta))
    ref = _reference(x, w, b)
    assert out.shape == (8, 64)
    assert jnp.allclose(out, ref, atol=1e-5, rtol=1e-5), "mismatch vs reference (small)"

    # Non-aligned shape exercising the multi-N-block grid + padding path.
    x2, w2, b2 = _make_inputs(k2, batch=16, in_features=200, out_features=300)
    w2_t, b2_2d, meta2 = prepare_dense(w2, b2)
    out2 = jax.block_until_ready(dense_forward(x2, w2_t, b2_2d, meta2))
    ref2 = _reference(x2, w2, b2)
    assert out2.shape == (16, 300)
    assert jnp.allclose(out2, ref2, atol=1e-5, rtol=1e-5), "mismatch vs reference (tiled)"

    print("KERNEL_OK")
</pallas_src>

<mosaic_0001>
module attributes {stable_mosaic.version = 11 : i64} {
  func.func @_dense_kernel(%arg0: i32, %arg1: i32, %arg2: i32, %arg3: memref<8x32xf32, #tpu.memory_space<vmem>>, %arg4: memref<32x128xf32, #tpu.memory_space<vmem>>, %arg5: memref<1x128xf32, #tpu.memory_space<vmem>>, %arg6: memref<8x128xf32, #tpu.memory_space<vmem>>) attributes {dimension_semantics = [#tpu.dimension_semantics<parallel>, #tpu.dimension_semantics<parallel>, #tpu.dimension_semantics<arbitrary>], iteration_bounds = array<i64: 1, 1, 1>, scalar_prefetch = 0 : i64, scratch_operands = 0 : i64, tpu.core_type = #tpu.core_type<tc>, window_params = [{transform_indices = @transform_0, window_bounds = array<i64: 8, 32>}, {transform_indices = @transform_1, window_bounds = array<i64: 32, 128>}, {transform_indices = @transform_2, window_bounds = array<i64: 1, 128>}, {transform_indices = @transform_3, window_bounds = array<i64: 8, 128>}]} {
    %c0_i32 = arith.constant 0 : i32
    %0 = arith.cmpi eq, %arg2, %c0_i32 : i32
    %1 = arith.extui %0 : i1 to i32
    %c0_i32_0 = arith.constant 0 : i32
    %2 = arith.cmpi ne, %1, %c0_i32_0 : i32
    scf.if %2 {
      %c0_10 = arith.constant 0 : index
      %c0_11 = arith.constant 0 : index
      %12 = vector.load %arg5[%c0_10, %c0_11] : memref<1x128xf32, #tpu.memory_space<vmem>>, vector<1x128xf32>
      %13 = vector.shape_cast %12 : vector<1x128xf32> to vector<1x128xf32>
      %14 = vector.broadcast %13 : vector<1x128xf32> to vector<8x128xf32>
      %c0_12 = arith.constant 0 : index
      %c0_13 = arith.constant 0 : index
      %15 = vector.load %arg6[%c0_12, %c0_13] : memref<8x128xf32, #tpu.memory_space<vmem>>, vector<8x128xf32>
      tpu.vector_store %arg6[%c0_12, %c0_13], %14 {strides = array<i32>} : memref<8x128xf32, #tpu.memory_space<vmem>>, vector<8x128xf32>,
    } else {
    }
    %c0 = arith.constant 0 : index
    %c0_1 = arith.constant 0 : index
    %3 = vector.load %arg6[%c0, %c0_1] : memref<8x128xf32, #tpu.memory_space<vmem>>, vector<8x128xf32>
    %c0_2 = arith.constant 0 : index
    %c0_3 = arith.constant 0 : index
    %4 = vector.load %arg3[%c0_2, %c0_3] : memref<8x32xf32, #tpu.memory_space<vmem>>, vector<8x32xf32>
    %c0_4 = arith.constant 0 : index
    %c0_5 = arith.constant 0 : index
    %5 = vector.load %arg4[%c0_4, %c0_5] : memref<32x128xf32, #tpu.memory_space<vmem>>, vector<32x128xf32>
    %cst = arith.constant dense<0.000000e+00> : vector<8x128xf32>
    %6 = tpu.matmul %4, %5, %cst {dimension_numbers = #tpu.dot_dimension_numbers<[1], [0], [0], [1], [0, 0, 1, 1], [], []>, precision = #tpu.contract_precision<fp32>} : vector<8x32xf32>, vector<32x128xf32>, vector<8x128xf32> -> vector<8x128xf32>
    %7 = arith.addf %3, %6 : vector<8x128xf32>
    %c0_6 = arith.constant 0 : index
    %c0_7 = arith.constant 0 : index
    %8 = vector.load %arg6[%c0_6, %c0_7] : memref<8x128xf32, #tpu.memory_space<vmem>>, vector<8x128xf32>
    tpu.vector_store %arg6[%c0_6, %c0_7], %7 {strides = array<i32>} : memref<8x128xf32, #tpu.memory_space<vmem>>, vector<8x128xf32>,
    %c0_i32_8 = arith.constant 0 : i32
    %9 = arith.cmpi eq, %arg2, %c0_i32_8 : i32
    %10 = arith.extui %9 : i1 to i32
    %c0_i32_9 = arith.constant 0 : i32
    %11 = arith.cmpi ne, %10, %c0_i32_9 : i32
    scf.if %11 {
      %c0_10 = arith.constant 0 : index
      %c0_11 = arith.constant 0 : index
      %12 = vector.load %arg6[%c0_10, %c0_11] : memref<8x128xf32, #tpu.memory_space<vmem>>, vector<8x128xf32>
      %cst_12 = arith.constant 0.000000e+00 : f32
      %13 = vector.broadcast %cst_12 : f32 to vector<8x128xf32>
      %14 = arith.subf %13, %12 : vector<8x128xf32>
      %15 = math.exp %14 : vector<8x128xf32>
      %cst_13 = arith.constant 1.000000e+00 : f32
      %16 = vector.broadcast %cst_13 : f32 to vector<8x128xf32>
      %17 = arith.addf %16, %15 : vector<8x128xf32>
      %cst_14 = arith.constant 1.000000e+00 : f32
      %18 = vector.broadcast %cst_14 : f32 to vector<8x128xf32>
      %19 = arith.divf %18, %17 : vector<8x128xf32>
      %c0_15 = arith.constant 0 : index
      %c0_16 = arith.constant 0 : index
      %20 = vector.load %arg6[%c0_15, %c0_16] : memref<8x128xf32, #tpu.memory_space<vmem>>, vector<8x128xf32>
      tpu.vector_store %arg6[%c0_15, %c0_16], %19 {strides = array<i32>} : memref<8x128xf32, #tpu.memory_space<vmem>>, vector<8x128xf32>,
    } else {
    }
    return
  }
  func.func @transform_0(%arg0: i32, %arg1: i32, %arg2: i32) -> (i32, i32) {
    %c0_i32 = arith.constant 0 : i32
    return %arg0, %arg2 : i32, i32
  }
  func.func @transform_1(%arg0: i32, %arg1: i32, %arg2: i32) -> (i32, i32) {
    %c0_i32 = arith.constant 0 : i32
    return %arg2, %arg1 : i32, i32
  }
  func.func @transform_2(%arg0: i32, %arg1: i32, %arg2: i32) -> (i32, i32) {
    %c0_i32 = arith.constant 0 : i32
    %c0_i32_0 = arith.constant 0 : i32
    return %c0_i32, %arg1 : i32, i32
  }
  func.func @transform_3(%arg0: i32, %arg1: i32, %arg2: i32) -> (i32, i32) {
    %c0_i32 = arith.constant 0 : i32
    return %arg0, %arg1 : i32, i32
  }
}

</mosaic_0001>

<bundles_post_ra>
// kernel: dense_forward.1
= control target key start
LH: loop header
LB: loop body
LE: loop exit
PB: predicated region body
PF: predicated region fallthrough
CT: control target
= control target key end

     0   :  { %8 = vsyncpa [#allocation3], 0  ;;  %s856_s0 = inlined_call_operand.hbm [shape: f32[8,32], index: 0, kind: input, shape index: {}]   ;;  %s857_s1 = inlined_call_operand.hbm [shape: f32[32,128], index: 1, kind: input, shape index: {}]   ;;  %s858_s2 = inlined_call_operand.vmem [shape: f32[1,128], index: 2, kind: input, shape index: {}]   ;;  %s859_s3 = inlined_call_operand.hbm [shape: f32[8,128], index: 3, kind: output, shape index: {}]  }
   0x1   :  { %9 = vsyncpa [#allocation6], 0 }
   0x2   :  { %10 = vsyncpa [#allocation4], 0  ;;  %s751_s12 = smov [#allocation2]   ;;  %s752_s14 = smov [#allocation5]  }
   0x3   :  { %s17_s13 = sshll.u32 %s751_s12, 4  ;;  %s26_s15 = sshll.u32 %s752_s14, 4  ;;  %s18_s13 = int_to_ptr.vmem [resolvable:$true] %s17_s13  ;;  %s27_s15 = int_to_ptr.vmem [resolvable:$true] %s26_s15 }
   0x4   :  { %s693_s16 = scalar_lea.vmem %s18_s13, 128  ;;  %p698_p1 = scmp.lt.s32.totalorder %s18_s13, %s18_s13 }
   0x5   :  { %p694_p0 = scmp.ne.s32.totalorder %s18_s13, %s693_s16  ;;  %p699_p2 = scmp.lt.s32.totalorder %s693_s16, %s693_s16 }
   0x7   :  { %p700_p3 = por %p699_p2, %p698_p1 }
   0x9   :  { %p701_p4 = pnand %p700_p3, %p694_p0 }
   0xb   :  { %704 = shalt.err (!%p701_p4)
}
   0xc   :  { %20 = dma.hbm_to_vmem [thread:$0]  %s856_s0, 128, %s18_s13, [#allocation3]  }
   0xd   :  { %s713_s19 = scalar_lea.vmem %s27_s15, 512  ;;  %p718_p6 = scmp.lt.s32.totalorder %s27_s15, %s27_s15 }
   0xe   :  { %p714_p5 = scmp.ne.s32.totalorder %s27_s15, %s713_s19  ;;  %p719_p7 = scmp.lt.s32.totalorder %s713_s19, %s713_s19 }
  0x10   :  { %p720_p8 = por %p719_p7, %p718_p6 }
  0x12   :  { %p721_p9 = pnand %p720_p8, %p714_p5 }
  0x14   :  { %724 = shalt.err (!%p721_p9)
}
  0x15   :  { %s753_s20 = smov 128   ;;  %s754_s21 = smov 8  }
  0x16   :  { %32 = dma.hbm_to_vmem [thread:$0]  %s857_s1, 512, %s27_s15, [#allocation6], %s753_s20, %s753_s20, %s754_s21  }
  0x17   :  { %745 = dma.done.wait [#allocation3], 128  }
  0x18   :  { %746 = vsyncadd [#allocation3], 4294967168 }
  0x19   :  { %747 = dma.done.wait [#allocation6], 512  }
  0x1a   :  { %748 = vsyncadd [#allocation6], 4294966784  ;;  %v755_v0 = vmov 0.0   ;;  %vm756_vm0 = vmmov 0   ;;  %vm59_vm1 = vcmask 261120   ;;  %v58_v1 = vld [vmem:[#allocation5 + $0x18] sm:$0xff] }
  0x1b   :  { %608 = vmatprep.subr.mxu0 %v755_v0  ;;  %619 = vmatprep.subr.mxu1 %v755_v0  ;;  %v57_v2 = vld [vmem:[#allocation5 + $0x10] sm:$0xff]  ;;  %v56_v3 = vld [vmem:[#allocation5 + $0x8] sm:$0xff]  ;;  %v790_v4 = vand.u32 4294901760, %v58_v1  ;;  %v55_v7 = vld [vmem:[#allocation5] sm:$0xff]  ;;  %s757_s24 = smov [#allocation7]  }
  0x1c   :  { %616 = vmatprep.mubr.msk.f32.mxu0 %vm756_vm0, %v755_v0  ;;  %627 = vmatprep.mubr.msk.f32.mxu1 %vm756_vm0, %v755_v0  ;;  %v792_v5 = vand.u32 4294901760, %v57_v2  ;;  %v794_v6 = vand.u32 4294901760, %v56_v3  ;;  %v54_v8 = vld [vmem:[#allocation2] sm:$0xff]  ;;  %v796_v9 = vand.u32 4294901760, %v55_v7  ;;  %s567_s25 = sshll.u32 %s757_s24, 4  ;;  %s568_s25 = int_to_ptr.vmem [resolvable:$true] %s567_s25 }
  0x1d   :  { %v61_v10 = vsel %vm59_vm1, %v54_v8, 0  ;;  %609 = vmatpush3.msra.mxu0 %v790_v4  ;;  %v168_v11 = vsub.f32 %v58_v1, %v790_v4  ;;  %v577_v46 = vld [vmem:[%s858_s2] ss:$0 sm:$0xff]  ;;  %s725_s26 = scalar_lea.vmem %s568_s25, 128  ;;  %p730_p11 = scmp.lt.s32.totalorder %s568_s25, %s568_s25 }
  0x1e   :  { %v800_v12 = vand.u32 4294901760, %v61_v10  ;;  %v175_v13 = vsub.f32 %v57_v2, %v792_v5  ;;  %v182_v14 = vsub.f32 %v56_v3, %v794_v6  ;;  %610 = vmatprep.subr.mxu0 %v755_v0  ;;  %v189_v15 = vsub.f32 %v55_v7, %v796_v9  ;;  %p726_p10 = scmp.ne.s32.totalorder %s568_s25, %s725_s26  ;;  %p731_p12 = scmp.lt.s32.totalorder %s725_s26, %s725_s26 }
  0x1f   :  { %611 = vmatpush3.msra.mxu0 %v792_v5  ;;  %v169_v16 = vand.u32 4294901760, %v168_v11 }
  0x20   :  { %v133_v17 = vsub.f32 %v61_v10, %v800_v12  ;;  %v176_v18 = vand.u32 4294901760, %v175_v13  ;;  %v183_v19 = vand.u32 4294901760, %v182_v14  ;;  %612 = vmatprep.subr.mxu0 %v755_v0  ;;  %v190_v20 = vand.u32 4294901760, %v189_v15  ;;  %p732_p13 = por %p731_p12, %p730_p11 }
  0x21   :  { %613 = vmatpush3.msra.mxu0 %v794_v6  ;;  %v170_v21 = vsub.f32 %v168_v11, %v169_v16 }
  0x22   :  { %v134_v22 = vand.u32 4294901760, %v133_v17  ;;  %v177_v23 = vsub.f32 %v175_v13, %v176_v18  ;;  %v184_v24 = vsub.f32 %v182_v14, %v183_v19  ;;  %614 = vmatprep.subr.mxu0 %v755_v0  ;;  %v191_v28 = vsub.f32 %v189_v15, %v190_v20  ;;  %p733_p0 = pnand %p732_p13, %p726_p10 }
  0x23   :  { %615 = vmatpush3.msra.mxu0 %v796_v9  ;;  %v171_v25 = vand.u32 4294901760, %v170_v21 }
  0x24   :  { %v135_v26 = vsub.f32 %v133_v17, %v134_v22  ;;  %v178_v27 = vand.u32 4294901760, %v177_v23  ;;  %630 = vmatprep.subr.mxu0 %v755_v0  ;;  %v185_v30 = vand.u32 4294901760, %v184_v24  ;;  %v192_v31 = vand.u32 4294901760, %v191_v28 }
  0x25   :  { %620 = vmatpush3.msra.mxu1 %v171_v25 }
  0x26   :  { %v136_v29 = vand.u32 4294901760, %v135_v26  ;;  %621 = vmatprep.subr.mxu1 %v755_v0 }
  0x27   :  { %622 = vmatpush3.msra.mxu1 %v178_v27 }
  0x28   :  { %617 = vmatmul.mubr.f32.vlgmr.msra.gmra.mxu0 %v136_v29  ;;  %623 = vmatprep.subr.mxu1 %v755_v0 }
  0x29   :  { %631 = vmatpush3.msra.mxu0 %v168_v11  ;;  %624 = vmatpush3.msra.mxu1 %v185_v30 }
  0x2a   :  { %632 = vmatprep.subr.mxu0 %v755_v0  ;;  %625 = vmatprep.subr.mxu1 %v755_v0 }
  0x2b   :  { %633 = vmatpush3.msra.mxu0 %v175_v13  ;;  %626 = vmatpush3.msra.mxu1 %v192_v31 }
  0x2c   :  { %634 = vmatprep.subr.mxu0 %v755_v0  ;;  %628 = vmatmul.mubr.f32.vlgmr.msra.gmra.mxu1 %v800_v12 }
  0x2d   :  { %635 = vmatpush3.msra.mxu0 %v182_v14  ;;  %641 = vmatprep.subr.mxu1 %v755_v0 }
  0x2e   :  { %636 = vmatprep.subr.mxu0 %v755_v0  ;;  %638 = vmatprep.mubr.msk.f32.mxu0 %vm756_vm0, %v755_v0 }
  0x2f   :  { %637 = vmatpush3.msra.mxu0 %v189_v15  ;;  %642 = vmatpush3.msra.mxu1 %v790_v4 }
  0x30   :  { %639 = vmatmul.mubr.f32.vlgmr.msra.gmra.mxu0 %v133_v17  ;;  %643 = vmatprep.subr.mxu1 %v755_v0 }
  0x31   :  { %652 = vmatprep.subr.mxu0 %v755_v0  ;;  %644 = vmatpush3.msra.mxu1 %v792_v5 }
  0x32   :  { %653 = vmatpush3.msra.mxu0 %v169_v16  ;;  %645 = vmatprep.subr.mxu1 %v755_v0 }
  0x33   :  { %654 = vmatprep.subr.mxu0 %v755_v0  ;;  %646 = vmatpush3.msra.mxu1 %v794_v6 }
  0x34   :  { %655 = vmatpush3.msra.mxu0 %v176_v18  ;;  %647 = vmatprep.subr.mxu1 %v755_v0 }
  0x35   :  { %656 = vmatprep.subr.mxu0 %v755_v0  ;;  %648 = vmatpush3.msra.mxu1 %v796_v9 }
  0x36   :  { %649 = vmatprep.mubr.msk.f32.mxu1 %vm756_vm0, %v755_v0  ;;  %657 = vmatpush3.msra.mxu0 %v183_v19 }
  0x37   :  { %650 = vmatmul.mubr.f32.vlgmr.msra.gmra.mxu1 %v134_v22  ;;  %658 = vmatprep.subr.mxu0 %v755_v0 }
  0x38   :  { %663 = vmatprep.subr.mxu1 %v755_v0  ;;  %659 = vmatpush3.msra.mxu0 %v190_v20 }
  0x39   :  { %660 = vmatprep.mubr.msk.f32.mxu0 %vm756_vm0, %v755_v0  ;;  %664 = vmatpush3.msra.mxu1 %v790_v4 }
  0x3a   :  { %661 = vmatmul.mubr.f32.vlgmr.msra.gmra.mxu0 %v800_v12  ;;  %665 = vmatprep.subr.mxu1 %v755_v0 }
  0x3b   :  { %671 = vmatprep.mubr.msk.f32.mxu1 %vm756_vm0, %v755_v0  ;;  %666 = vmatpush3.msra.mxu1 %v792_v5 }
  0x3c   :  { %667 = vmatprep.subr.mxu1 %v755_v0 }
  0x3d   :  { %668 = vmatpush3.msra.mxu1 %v794_v6 }
  0x3e   :  { %669 = vmatprep.subr.mxu1 %v755_v0 }
  0x3f   :  { %670 = vmatpush3.msra.mxu1 %v796_v9 }
  0x40   :  { %672 = vmatmul.mubr.f32.vlgmr.msra.gmra.mxu1 %v800_v12 }
  0xe8   :  { %v138_v32 = vpop.f32.mrf.mxu0 }
  0xea   :  { %v618_v33 = vpop.f32.mrf.mxu0 }
  0xec   :  { %v229_v34 = vpop.f32.mrf.mxu1 }
  0xed   :  { %v230_v38 = vadd.f32 %v229_v34, %v138_v32 }
  0xee   :  { %v629_v35 = vpop.f32.mrf.mxu1 }
  0xf0   :  { %v309_v36 = vpop.f32.mrf.mxu0 }
  0xf1   :  { %v310_v41 = vadd.f32 %v309_v36, %v230_v38 }
  0xf2   :  { %v640_v37 = vpop.f32.mrf.mxu0 }
  0xf7   :  { %v386_v39 = vpop.f32.mrf.mxu1 }
  0xf8   :  { %v387_v43 = vadd.f32 %v386_v39, %v310_v41 }
  0xf9   :  { %v651_v40 = vpop.f32.mrf.mxu1 }
  0xfa   :  { %v469_v42 = vpop.f32.mrf.mxu0 }
  0xfb   :  { %v470_v45 = vadd.f32 %v469_v42, %v387_v43 }
  0xfc   :  { %v662_v44 = vpop.f32.mrf.mxu0 }
 0x100   :  { %v544_v47 = vpop.f32.mrf.mxu1 }
 0x101   :  { %v545_v48 = vadd.f32 %v544_v47, %v470_v45 }
 0x102   :  { %v673_v49 = vpop.f32.mrf.mxu1 }
 0x103   :  { %v548_v50 = vadd.f32 %v577_v46, %v545_v48 }
 0x105   :  { %v554_v51 = vsub.f32 0.0, %v548_v50 }
 0x107   :  { %v555_v52 = vmul.f32 1.442695, %v554_v51 }
 0x109   :  { %681 = vpow2.f32 %v555_v52 }
 0x116   :  { %v682_v53 = vpop.eup %681 }
 0x117   :  { %v557_v54 = vadd.f32 1.0, %v682_v53 }
 0x119   :  { %683 = vrcp.f32 %v557_v54 }
 0x126   :  { %v684_v55 = vpop.eup %683 }
 0x127   :  { %560 = vst [vmem:[#allocation7] sm:$0xff] %v684_v55 }
 0x128   :  { %736 = shalt.err (!%p733_p0)
}
 0x129   :  { %570 = dma.vmem_to_hbm [thread:$0]  %s568_s25, 128, %s859_s3, [#allocation4]  }
 0x12a   :  { %749 = dma.done.wait [#allocation4], 128  }
 0x12b   :  { %750 = vsyncadd [#allocation4], 4294967168 }
 0x12c   :  { %574 = vsyncpa [#allocation3], 1 }
 0x12d   :  { %575 = vsyncpa [#allocation6], 1 }
 0x12e   :  { %576 = vsyncpa [#allocation4], 1 }

</bundles_post_ra>
